<compile_context>
chip_gen: v5e
topology: v5e:2x2
jax: 0.10.0
libtpu: 0.0.40
codegen_flags: <defaults>
</compile_context>

<pallas_src>
import jax
import jax.numpy as jnp
from jax.experimental import pallas as pl
from jax.experimental.pallas import tpu as pltpu

N_IN = 784     # fixed by `x.view(-1, 784)` in the reference forward()
N_HID = 128
Z_DIM = 32
C_DIM = 0      # module asserts c_dim == 0 and c == None
BATCH = 16


def vae_kernel(x_ref, eps_ref,
               w1_ref, b1_ref, w2_ref, b2_ref,
               w3_ref, b3_ref, w4_ref, b4_ref,
               recon_ref, mulogvar_ref):
    # encode: h1 = relu(fc1(x)); [mu | logvar] = h1 @ [w21 | w22] + [b21 | b22]
    x = x_ref[...].astype(jnp.bfloat16)
    h1 = jnp.dot(x, w1_ref[...], preferred_element_type=jnp.float32) + b1_ref[...]
    h1 = jnp.maximum(h1, 0.0)

    ml = jnp.dot(h1.astype(jnp.bfloat16), w2_ref[...],
                 preferred_element_type=jnp.float32) + b2_ref[...]
    mu = ml[:, :Z_DIM]
    logvar = ml[:, Z_DIM:]

    # reparameterize: z = mu + eps * exp(0.5 * logvar)
    # (eps ~ Uniform[0,1) to mirror torch.rand_like in the reference; sampled in wrapper)
    std = jnp.exp(0.5 * logvar)
    z = mu + eps_ref[...] * std

    # decode: h3 = relu(fc3(z)); recon = sigmoid(fc4(h3))
    h3 = jnp.dot(z.astype(jnp.bfloat16), w3_ref[...],
                 preferred_element_type=jnp.float32) + b3_ref[...]
    h3 = jnp.maximum(h3, 0.0)
    logits = jnp.dot(h3.astype(jnp.bfloat16), w4_ref[...],
                     preferred_element_type=jnp.float32) + b4_ref[...]

    recon_ref[...] = jax.nn.sigmoid(logits)
    mulogvar_ref[...] = ml


def _choose_tm(batch):
    # Fill the MXU's M dimension when the batch allows it; stay sublane-aligned (8).
    for tm in (512, 256, 128, 64, 32, 16, 8):
        if batch >= tm:
            return tm
    return 8


def vae_forward(x, eps, params):
    """x: (B, 1, 28, 28) or (B, 784); eps: (B, Z_DIM); params: dict of W/b.

    Returns (reconstruction, mu, logvar) exactly like the PyTorch forward()."""
    x2 = x.reshape(-1, N_IN).astype(jnp.float32)     # x.view(-1, 784)
    B = x2.shape[0]

    tm = _choose_tm(B)
    b_pad = pl.cdiv(B, tm) * tm
    if b_pad != B:
        x2 = jnp.pad(x2, ((0, b_pad - B), (0, 0)))
        eps = jnp.pad(eps, ((0, b_pad - B), (0, 0)))

    grid = (b_pad // tm,)

    row_spec = lambda n: pl.BlockSpec((tm, n), lambda i: (i, 0))      # tiled over batch
    const_spec = lambda shape: pl.BlockSpec(shape, lambda i: (0, 0))  # resident weights

    in_specs = [
        row_spec(N_IN),                   # x
        row_spec(Z_DIM),                  # eps
        const_spec((N_IN, N_HID)),        # w1  (bf16)
        const_spec((1, N_HID)),           # b1
        const_spec((N_HID, 2 * Z_DIM)),   # w2 = [w21 | w22]  (bf16)
        const_spec((1, 2 * Z_DIM)),       # b2 = [b21 | b22]
        const_spec((Z_DIM, N_HID)),       # w3  (bf16)
        const_spec((1, N_HID)),           # b3
        const_spec((N_HID, N_IN)),        # w4  (bf16)
        const_spec((1, N_IN)),            # b4
    ]
    out_specs = (row_spec(N_IN), row_spec(2 * Z_DIM))

    recon, mulogvar = pl.pallas_call(
        vae_kernel,
        grid=grid,
        out_shape=(
            jax.ShapeDtypeStruct((b_pad, N_IN), jnp.float32),
            jax.ShapeDtypeStruct((b_pad, 2 * Z_DIM), jnp.float32),
        ),
        in_specs=in_specs,
        out_specs=out_specs,
        compiler_params=pltpu.CompilerParams(
            dimension_semantics=("parallel",),
            vmem_limit_bytes=64 << 20,
        ),
    )(
        x2, eps,
        params["w1"], params["b1"],
        params["w2"], params["b2"],
        params["w3"], params["b3"],
        params["w4"], params["b4"],
    )

    recon = recon[:B]
    mu = mulogvar[:B, :Z_DIM]
    logvar = mulogvar[:B, Z_DIM:]
    return recon, mu, logvar


def init_params(key):
    """Deterministic nn.Linear-style init (uniform +/- 1/sqrt(fan_in)).
    Weights stored as (in_features, out_features) in bf16; biases kept f32."""
    keys = jax.random.split(key, 10)

    def linear(kw, kb, fan_in, fan_out):
        bound = 1.0 / float(fan_in) ** 0.5
        w = jax.random.uniform(kw, (fan_in, fan_out), jnp.float32, -bound, bound)
        b = jax.random.uniform(kb, (1, fan_out), jnp.float32, -bound, bound)
        return w, b

    w1, b1 = linear(keys[0], keys[1], N_IN, N_HID)     # fc1
    w21, b21 = linear(keys[2], keys[3], N_HID, Z_DIM)  # fc21
    w22, b22 = linear(keys[4], keys[5], N_HID, Z_DIM)  # fc22
    w3, b3 = linear(keys[6], keys[7], Z_DIM, N_HID)    # fc3
    w4, b4 = linear(keys[8], keys[9], N_HID, N_IN)     # fc4

    p = {
        "w1": w1.astype(jnp.bfloat16), "b1": b1,
        # fuse the two encoder heads: one (N_HID, 2*Z_DIM) matmul instead of two N=32 ones
        "w2": jnp.concatenate([w21, w22], axis=1).astype(jnp.bfloat16),
        "b2": jnp.concatenate([b21, b22], axis=1),
        "w3": w3.astype(jnp.bfloat16), "b3": b3,
        "w4": w4.astype(jnp.bfloat16), "b4": b4,
    }
    return p


if __name__ == "__main__":
    key = jax.random.PRNGKey(0)
    k_params, k_x, k_eps = jax.random.split(key, 3)

    params = init_params(k_params)
    # MNIST-like input in [0, 1), NCHW -> flattened inside the wrapper.
    x = jax.random.uniform(k_x, (BATCH, 1, 28, 28), jnp.float32)
    # torch.rand_like draws Uniform[0,1); noise is sampled outside the kernel so the
    # forward pass is deterministic given the PRNG key.
    eps = jax.random.uniform(k_eps, (BATCH, Z_DIM), jnp.float32)

    recon, mu, logvar = vae_forward(x, eps, params)
    jax.block_until_ready((recon, mu, logvar))

    assert recon.shape == (BATCH, N_IN)
    assert mu.shape == (BATCH, Z_DIM)
    assert logvar.shape == (BATCH, Z_DIM)
    assert bool(jnp.all(jnp.isfinite(recon)))
    assert bool(jnp.all((recon >= 0.0) & (recon <= 1.0)))
    print("KERNEL_OK")
</pallas_src>

<mosaic_0001>
module attributes {stable_mosaic.version = 11 : i64} {
  func.func @vae_kernel(%arg0: i32, %arg1: memref<16x784xf32, #tpu.memory_space<vmem>>, %arg2: memref<16x32xf32, #tpu.memory_space<vmem>>, %arg3: memref<784x128xbf16, #tpu.memory_space<vmem>>, %arg4: memref<1x128xf32, #tpu.memory_space<vmem>>, %arg5: memref<128x64xbf16, #tpu.memory_space<vmem>>, %arg6: memref<1x64xf32, #tpu.memory_space<vmem>>, %arg7: memref<32x128xbf16, #tpu.memory_space<vmem>>, %arg8: memref<1x128xf32, #tpu.memory_space<vmem>>, %arg9: memref<128x784xbf16, #tpu.memory_space<vmem>>, %arg10: memref<1x784xf32, #tpu.memory_space<vmem>>, %arg11: memref<16x784xf32, #tpu.memory_space<vmem>>, %arg12: memref<16x64xf32, #tpu.memory_space<vmem>>) attributes {dimension_semantics = [#tpu.dimension_semantics<parallel>], iteration_bounds = array<i64: 1>, scalar_prefetch = 0 : i64, scratch_operands = 0 : i64, tpu.core_type = #tpu.core_type<tc>, window_params = [{transform_indices = @transform_0, window_bounds = array<i64: 16, 784>}, {transform_indices = @transform_1, window_bounds = array<i64: 16, 32>}, {pipeline_mode = #tpu.pipeline_mode<synchronous>, transform_indices = @transform_2, window_bounds = array<i64: 784, 128>}, {pipeline_mode = #tpu.pipeline_mode<synchronous>, transform_indices = @transform_3, window_bounds = array<i64: 1, 128>}, {pipeline_mode = #tpu.pipeline_mode<synchronous>, transform_indices = @transform_4, window_bounds = array<i64: 128, 64>}, {pipeline_mode = #tpu.pipeline_mode<synchronous>, transform_indices = @transform_5, window_bounds = array<i64: 1, 64>}, {pipeline_mode = #tpu.pipeline_mode<synchronous>, transform_indices = @transform_6, window_bounds = array<i64: 32, 128>}, {pipeline_mode = #tpu.pipeline_mode<synchronous>, transform_indices = @transform_7, window_bounds = array<i64: 1, 128>}, {pipeline_mode = #tpu.pipeline_mode<synchronous>, transform_indices = @transform_8, window_bounds = array<i64: 128, 784>}, {pipeline_mode = #tpu.pipeline_mode<synchronous>, transform_indices = @transform_9, window_bounds = array<i64: 1, 784>}, {transform_indices = @transform_10, window_bounds = array<i64: 16, 784>}, {transform_indices = @transform_11, window_bounds = array<i64: 16, 64>}]} {
    %c0 = arith.constant 0 : index
    %c0_0 = arith.constant 0 : index
    %0 = vector.load %arg1[%c0, %c0_0] : memref<16x784xf32, #tpu.memory_space<vmem>>, vector<16x784xf32>
    %1 = arith.truncf %0 : vector<16x784xf32> to vector<16x784xbf16>
    %c0_1 = arith.constant 0 : index
    %c0_2 = arith.constant 0 : index
    %2 = vector.load %arg3[%c0_1, %c0_2] : memref<784x128xbf16, #tpu.memory_space<vmem>>, vector<784x128xbf16>
    %cst = arith.constant dense<0.000000e+00> : vector<16x128xf32>
    %3 = tpu.matmul %1, %2, %cst {dimension_numbers = #tpu.dot_dimension_numbers<[1], [0], [0], [1], [0, 0, 1, 1], [], []>} : vector<16x784xbf16>, vector<784x128xbf16>, vector<16x128xf32> -> vector<16x128xf32>
    %c0_3 = arith.constant 0 : index
    %c0_4 = arith.constant 0 : index
    %4 = vector.load %arg4[%c0_3, %c0_4] : memref<1x128xf32, #tpu.memory_space<vmem>>, vector<1x128xf32>
    %5 = vector.broadcast %4 : vector<1x128xf32> to vector<16x128xf32>
    %6 = arith.addf %3, %5 : vector<16x128xf32>
    %cst_5 = arith.constant 0.000000e+00 : f32
    %7 = vector.broadcast %cst_5 : f32 to vector<16x128xf32>
    %8 = arith.maximumf %6, %7 : vector<16x128xf32>
    %9 = arith.truncf %8 : vector<16x128xf32> to vector<16x128xbf16>
    %c0_6 = arith.constant 0 : index
    %c0_7 = arith.constant 0 : index
    %10 = vector.load %arg5[%c0_6, %c0_7] : memref<128x64xbf16, #tpu.memory_space<vmem>>, vector<128x64xbf16>
    %cst_8 = arith.constant dense<0.000000e+00> : vector<16x64xf32>
    %11 = tpu.matmul %9, %10, %cst_8 {dimension_numbers = #tpu.dot_dimension_numbers<[1], [0], [0], [1], [0, 0, 1, 1], [], []>} : vector<16x128xbf16>, vector<128x64xbf16>, vector<16x64xf32> -> vector<16x64xf32>
    %c0_9 = arith.constant 0 : index
    %c0_10 = arith.constant 0 : index
    %12 = vector.load %arg6[%c0_9, %c0_10] : memref<1x64xf32, #tpu.memory_space<vmem>>, vector<1x64xf32>
    %13 = vector.broadcast %12 : vector<1x64xf32> to vector<16x64xf32>
    %14 = arith.addf %11, %13 : vector<16x64xf32>
    %15 = vector.extract_strided_slice %14 {offsets = [0, 0], sizes = [16, 32], strides = [1, 1]} : vector<16x64xf32> to vector<16x32xf32>
    %16 = vector.extract_strided_slice %14 {offsets = [0, 32], sizes = [16, 32], strides = [1, 1]} : vector<16x64xf32> to vector<16x32xf32>
    %cst_11 = arith.constant 5.000000e-01 : f32
    %17 = vector.broadcast %cst_11 : f32 to vector<16x32xf32>
    %18 = arith.mulf %17, %16 : vector<16x32xf32>
    %19 = math.exp %18 : vector<16x32xf32>
    %c0_12 = arith.constant 0 : index
    %c0_13 = arith.constant 0 : index
    %20 = vector.load %arg2[%c0_12, %c0_13] : memref<16x32xf32, #tpu.memory_space<vmem>>, vector<16x32xf32>
    %21 = arith.mulf %20, %19 : vector<16x32xf32>
    %22 = arith.addf %15, %21 : vector<16x32xf32>
    %23 = arith.truncf %22 : vector<16x32xf32> to vector<16x32xbf16>
    %c0_14 = arith.constant 0 : index
    %c0_15 = arith.constant 0 : index
    %24 = vector.load %arg7[%c0_14, %c0_15] : memref<32x128xbf16, #tpu.memory_space<vmem>>, vector<32x128xbf16>
    %cst_16 = arith.constant dense<0.000000e+00> : vector<16x128xf32>
    %25 = tpu.matmul %23, %24, %cst_16 {dimension_numbers = #tpu.dot_dimension_numbers<[1], [0], [0], [1], [0, 0, 1, 1], [], []>} : vector<16x32xbf16>, vector<32x128xbf16>, vector<16x128xf32> -> vector<16x128xf32>
    %c0_17 = arith.constant 0 : index
    %c0_18 = arith.constant 0 : index
    %26 = vector.load %arg8[%c0_17, %c0_18] : memref<1x128xf32, #tpu.memory_space<vmem>>, vector<1x128xf32>
    %27 = vector.broadcast %26 : vector<1x128xf32> to vector<16x128xf32>
    %28 = arith.addf %25, %27 : vector<16x128xf32>
    %cst_19 = arith.constant 0.000000e+00 : f32
    %29 = vector.broadcast %cst_19 : f32 to vector<16x128xf32>
    %30 = arith.maximumf %28, %29 : vector<16x128xf32>
    %31 = arith.truncf %30 : vector<16x128xf32> to vector<16x128xbf16>
    %c0_20 = arith.constant 0 : index
    %c0_21 = arith.constant 0 : index
    %32 = vector.load %arg9[%c0_20, %c0_21] : memref<128x784xbf16, #tpu.memory_space<vmem>>, vector<128x784xbf16>
    %cst_22 = arith.constant dense<0.000000e+00> : vector<16x784xf32>
    %33 = tpu.matmul %31, %32, %cst_22 {dimension_numbers = #tpu.dot_dimension_numbers<[1], [0], [0], [1], [0, 0, 1, 1], [], []>} : vector<16x128xbf16>, vector<128x784xbf16>, vector<16x784xf32> -> vector<16x784xf32>
    %c0_23 = arith.constant 0 : index
    %c0_24 = arith.constant 0 : index
    %34 = vector.load %arg10[%c0_23, %c0_24] : memref<1x784xf32, #tpu.memory_space<vmem>>, vector<1x784xf32>
    %35 = vector.broadcast %34 : vector<1x784xf32> to vector<16x784xf32>
    %36 = arith.addf %33, %35 : vector<16x784xf32>
    %37 = arith.negf %36 : vector<16x784xf32>
    %38 = math.exp %37 : vector<16x784xf32>
    %cst_25 = arith.constant 1.000000e+00 : f32
    %39 = vector.broadcast %cst_25 : f32 to vector<16x784xf32>
    %40 = arith.addf %39, %38 : vector<16x784xf32>
    %41 = arith.divf %39, %40 : vector<16x784xf32>
    %c0_26 = arith.constant 0 : index
    %c0_27 = arith.constant 0 : index
    %42 = vector.load %arg11[%c0_26, %c0_27] : memref<16x784xf32, #tpu.memory_space<vmem>>, vector<16x784xf32>
    tpu.vector_store %arg11[%c0_26, %c0_27], %41 {strides = array<i32>} : memref<16x784xf32, #tpu.memory_space<vmem>>, vector<16x784xf32>,
    %c0_28 = arith.constant 0 : index
    %c0_29 = arith.constant 0 : index
    %43 = vector.load %arg12[%c0_28, %c0_29] : memref<16x64xf32, #tpu.memory_space<vmem>>, vector<16x64xf32>
    tpu.vector_store %arg12[%c0_28, %c0_29], %14 {strides = array<i32>} : memref<16x64xf32, #tpu.memory_space<vmem>>, vector<16x64xf32>,
    return
  }
  func.func @transform_0(%arg0: i32) -> (i32, i32) {
    %c0_i32 = arith.constant 0 : i32
    %c0_i32_0 = arith.constant 0 : i32
    return %arg0, %c0_i32 : i32, i32
  }
  func.func @transform_1(%arg0: i32) -> (i32, i32) {
    %c0_i32 = arith.constant 0 : i32
    %c0_i32_0 = arith.constant 0 : i32
    return %arg0, %c0_i32 : i32, i32
  }
  func.func @transform_2(%arg0: i32) -> (i32, i32) {
    %c0_i32 = arith.constant 0 : i32
    %c0_i32_0 = arith.constant 0 : i32
    %c0_i32_1 = arith.constant 0 : i32
    return %c0_i32, %c0_i32_0 : i32, i32
  }
  func.func @transform_3(%arg0: i32) -> (i32, i32) {
    %c0_i32 = arith.constant 0 : i32
    %c0_i32_0 = arith.constant 0 : i32
    %c0_i32_1 = arith.constant 0 : i32
    return %c0_i32, %c0_i32_0 : i32, i32
  }
  func.func @transform_4(%arg0: i32) -> (i32, i32) {
    %c0_i32 = arith.constant 0 : i32
    %c0_i32_0 = arith.constant 0 : i32
    %c0_i32_1 = arith.constant 0 : i32
    return %c0_i32, %c0_i32_0 : i32, i32
  }
  func.func @transform_5(%arg0: i32) -> (i32, i32) {
    %c0_i32 = arith.constant 0 : i32
    %c0_i32_0 = arith.constant 0 : i32
    %c0_i32_1 = arith.constant 0 : i32
    return %c0_i32, %c0_i32_0 : i32, i32
  }
  func.func @transform_6(%arg0: i32) -> (i32, i32) {
    %c0_i32 = arith.constant 0 : i32
    %c0_i32_0 = arith.constant 0 : i32
    %c0_i32_1 = arith.constant 0 : i32
    return %c0_i32, %c0_i32_0 : i32, i32
  }
  func.func @transform_7(%arg0: i32) -> (i32, i32) {
    %c0_i32 = arith.constant 0 : i32
    %c0_i32_0 = arith.constant 0 : i32
    %c0_i32_1 = arith.constant 0 : i32
    return %c0_i32, %c0_i32_0 : i32, i32
  }
  func.func @transform_8(%arg0: i32) -> (i32, i32) {
    %c0_i32 = arith.constant 0 : i32
    %c0_i32_0 = arith.constant 0 : i32
    %c0_i32_1 = arith.constant 0 : i32
    return %c0_i32, %c0_i32_0 : i32, i32
  }
  func.func @transform_9(%arg0: i32) -> (i32, i32) {
    %c0_i32 = arith.constant 0 : i32
    %c0_i32_0 = arith.constant 0 : i32
    %c0_i32_1 = arith.constant 0 : i32
    return %c0_i32, %c0_i32_0 : i32, i32
  }
  func.func @transform_10(%arg0: i32) -> (i32, i32) {
    %c0_i32 = arith.constant 0 : i32
    %c0_i32_0 = arith.constant 0 : i32
    return %arg0, %c0_i32 : i32, i32
  }
  func.func @transform_11(%arg0: i32) -> (i32, i32) {
    %c0_i32 = arith.constant 0 : i32
    %c0_i32_0 = arith.constant 0 : i32
    return %arg0, %c0_i32 : i32, i32
  }
}

</mosaic_0001>

<bundles_post_ra>
// kernel: tpu_custom_call.1
= control target key start
LH: loop header
LB: loop body
LE: loop exit
PB: predicated region body
PF: predicated region fallthrough
CT: control target
= control target key end

     0   :  { %17 = vsyncpa [#allocation3], 0  ;;  %s3017_s0 = inlined_call_operand.vmem [shape: f32[16,784], index: 0, kind: input, shape index: {}]   ;;  %s3018_s1 = inlined_call_operand.vmem [shape: f32[16,32], index: 1, kind: input, shape index: {}]   ;;  %s3019_s2 = inlined_call_operand.vmem [shape: bf16[784,128], index: 2, kind: input, shape index: {}]   ;;  %s3020_s3 = inlined_call_operand.vmem [shape: f32[1,128], index: 3, kind: input, shape index: {}]   ;;  %s3021_s4 = inlined_call_operand.vmem [shape: bf16[128,64], index: 4, kind: input, shape index: {}]   ;;  %s3022_s5 = inlined_call_operand.vmem [shape: f32[1,64], index: 5, kind: input, shape index: {}]   ;;  %s3023_s6 = inlined_call_operand.vmem [shape: bf16[32,128], index: 6, kind: input, shape index: {}]   ;;  %s3024_s7 = inlined_call_operand.vmem [shape: f32[1,128], index: 7, kind: input, shape index: {}]   ;;  %s3025_s8 = inlined_call_operand.vmem [shape: bf16[128,784], index: 8, kind: input, shape index: {}]   ;;  %s3026_s9 = inlined_call_operand.vmem [shape: f32[1,784], index: 9, kind: input, shape index: {}]   ;;  %s3027_s10 = inlined_call_operand.hbm [shape: f32[16,784], index: 10, kind: output, shape index: {0}]   ;;  %s3028_s11 = inlined_call_operand.hbm [shape: f32[16,64], index: 11, kind: output, shape index: {1}]  }
   0x1   :  { %v1974_v0 = vld [vmem:[%s3019_s2 + $0x38] sm:$0xff]  ;;  %v1973_v4 = vld [vmem:[%s3019_s2 + $0x30] sm:$0xff]  ;;  %v1972_v8 = vld [vmem:[%s3019_s2 + $0x28] sm:$0xff] }
   0x2   :  { %v1982_v1 = vld [vmem:[%s3019_s2 + $0x78] sm:$0xff]  ;;  %461 = vmatpush.bf16.msra.mxu0 %v1974_v0  ;;  %v1981_v5 = vld [vmem:[%s3019_s2 + $0x70] sm:$0xff]  ;;  %v1980_v9 = vld [vmem:[%s3019_s2 + $0x68] sm:$0xff] }
   0x3   :  { %v1990_v2 = vld [vmem:[%s3019_s2 + $0xb8] sm:$0xff]  ;;  %475 = vmatpush.bf16.msra.mxu1 %v1982_v1  ;;  %v1989_v6 = vld [vmem:[%s3019_s2 + $0xb0] sm:$0xff]  ;;  %v1988_v10 = vld [vmem:[%s3019_s2 + $0xa8] sm:$0xff] }
   0x4   :  { %v1998_v3 = vld [vmem:[%s3019_s2 + $0xf8] sm:$0xff]  ;;  %489 = vmatpush.bf16.msra.mxu2 %v1990_v2  ;;  %v1997_v7 = vld [vmem:[%s3019_s2 + $0xf0] sm:$0xff]  ;;  %v1996_v11 = vld [vmem:[%s3019_s2 + $0xe8] sm:$0xff] }
   0x5   :  { %503 = vmatpush.bf16.msra.mxu3 %v1998_v3  ;;  %v1971_v12 = vld [vmem:[%s3019_s2 + $0x20] sm:$0xff]  ;;  %v1970_v16 = vld [vmem:[%s3019_s2 + $0x18] sm:$0xff]  ;;  %v1969_v20 = vld [vmem:[%s3019_s2 + $0x10] sm:$0xff] }
   0x6   :  { %462 = vmatpush.bf16.msra.mxu0 %v1973_v4  ;;  %v1979_v13 = vld [vmem:[%s3019_s2 + $0x60] sm:$0xff]  ;;  %v1978_v17 = vld [vmem:[%s3019_s2 + $0x58] sm:$0xff]  ;;  %v1977_v21 = vld [vmem:[%s3019_s2 + $0x50] sm:$0xff] }
   0x7   :  { %476 = vmatpush.bf16.msra.mxu1 %v1981_v5  ;;  %v1987_v14 = vld [vmem:[%s3019_s2 + $0xa0] sm:$0xff]  ;;  %v1986_v18 = vld [vmem:[%s3019_s2 + $0x98] sm:$0xff]  ;;  %v1985_v22 = vld [vmem:[%s3019_s2 + $0x90] sm:$0xff] }
   0x8   :  { %490 = vmatpush.bf16.msra.mxu2 %v1989_v6  ;;  %v1995_v15 = vld [vmem:[%s3019_s2 + $0xe0] sm:$0xff]  ;;  %v1994_v19 = vld [vmem:[%s3019_s2 + $0xd8] sm:$0xff]  ;;  %v1993_v23 = vld [vmem:[%s3019_s2 + $0xd0] sm:$0xff] }
   0x9   :  { %504 = vmatpush.bf16.msra.mxu3 %v1997_v7 }
   0xa   :  { %463 = vmatpush.bf16.msra.mxu0 %v1972_v8 }
   0xb   :  { %477 = vmatpush.bf16.msra.mxu1 %v1980_v9 }
   0xc   :  { %491 = vmatpush.bf16.msra.mxu2 %v1988_v10 }
   0xd   :  { %505 = vmatpush.bf16.msra.mxu3 %v1996_v11 }
   0xe   :  { %464 = vmatpush.bf16.msra.mxu0 %v1971_v12 }
   0xf   :  { %478 = vmatpush.bf16.msra.mxu1 %v1979_v13 }
  0x10   :  { %492 = vmatpush.bf16.msra.mxu2 %v1987_v14 }
  0x11   :  { %506 = vmatpush.bf16.msra.mxu3 %v1995_v15 }
  0x12   :  { %465 = vmatpush.bf16.msra.mxu0 %v1970_v16 }
  0x13   :  { %479 = vmatpush.bf16.msra.mxu1 %v1978_v17 }
  0x14   :  { %493 = vmatpush.bf16.msra.mxu2 %v1986_v18 }
  0x15   :  { %507 = vmatpush.bf16.msra.mxu3 %v1994_v19 }
  0x16   :  { %18 = vsyncpa [#allocation5], 0  ;;  %466 = vmatpush.bf16.msra.mxu0 %v1969_v20  ;;  %v1968_v24 = vld [vmem:[%s3019_s2 + $0x8] sm:$0xff]  ;;  %v1967_v28 = vld [vmem:[%s3019_s2] sm:$0xff]  ;;  %vm457_vm0 = vcmask 130048   ;;  %vm1452_vm1 = vcmask 523264  }
  0x17   :  { %480 = vmatpush.bf16.msra.mxu1 %v1977_v21  ;;  %v1976_v25 = vld [vmem:[%s3019_s2 + $0x48] sm:$0xff]  ;;  %v1975_v29 = vld [vmem:[%s3019_s2 + $0x40] sm:$0xff]  ;;  %v47_v31 = vld [vmem:[%s3017_s0 + $0x38] sm:$0xff]  ;;  %vm685_vm2 = vcmask 261120   ;;  %s1474_s13 = sshll.u32 %s3028_s11, 4  ;;  %s2207_s14 = smov 8   ;;  %s1475_s13 = int_to_ptr.hbm [resolvable:$true] %s1474_s13 }
  0x18   :  { %494 = vmatpush.bf16.msra.mxu2 %v1985_v22  ;;  %v1984_v26 = vld [vmem:[%s3019_s2 + $0x88] sm:$0xff]  ;;  %v40_v30 = vld [vmem:[%s3017_s0] sm:$0xff]  ;;  %v2006_v34 = vld [vmem:[%s3019_s2 + $0x138] sm:$0xff]  ;;  %s2210_s18 = smov 56  }
  0x19   :  { %508 = vmatpush.bf16.msra.mxu3 %v1993_v23  ;;  %v1992_v27 = vld [vmem:[%s3019_s2 + $0xc8] sm:$0xff]  ;;  %v48_v33 = vld [vmem:[%s3017_s0 + $0x40] sm:$0xff]  ;;  %v2014_v35 = vld [vmem:[%s3019_s2 + $0x178] sm:$0xff]  ;;  %v54_v40 = vpack.c.bf16 %v47_v31, %v40_v30 }
  0x1a   :  { %467 = vmatpush.bf16.msra.mxu0 %v1968_v24  ;;  %v41_v32 = vld [vmem:[%s3017_s0 + $0x8] sm:$0xff]  ;;  %v1983_v36 = vld [vmem:[%s3019_s2 + $0x80] sm:$0xff]  ;;  %v42_v38 = vld [vmem:[%s3017_s0 + $0x10] sm:$0xff] }
  0x1b   :  { %481 = vmatpush.bf16.msra.mxu1 %v1976_v25  ;;  %v1991_v37 = vld [vmem:[%s3019_s2 + $0xc0] sm:$0xff]  ;;  %v49_v39 = vld [vmem:[%s3017_s0 + $0x48] sm:$0xff]  ;;  %v43_v41 = vld [vmem:[%s3017_s0 + $0x18] sm:$0xff]  ;;  %v55_v43 = vpack.c.bf16 %v48_v33, %v41_v32 }
  0x1c   :  { %495 = vmatpush.bf16.msra.mxu2 %v1984_v26  ;;  %v50_v42 = vld [vmem:[%s3017_s0 + $0x50] sm:$0xff]  ;;  %v2015_v44 = vld [vmem:[%s3019_s2 + $0x180] sm:$0xff]  ;;  %v56_v47 = vpack.c.bf16 %v49_v39, %v42_v38  ;;  %v2004_v49 = vld [vmem:[%s3019_s2 + $0x128] sm:$0xff] }
  0x1d   :  { %509 = vmatpush.bf16.msra.mxu3 %v1992_v27  ;;  %v2005_v45 = vld [vmem:[%s3019_s2 + $0x130] sm:$0xff]  ;;  %v57_v48 = vpack.c.bf16 %v50_v42, %v43_v41  ;;  %v2012_v50 = vld [vmem:[%s3019_s2 + $0x168] sm:$0xff]  ;;  %v2003_v51 = vld [vmem:[%s3019_s2 + $0x120] sm:$0xff] }
  0x1e   :  { %468 = vmatpush.bf16.msra.mxu0 %v1967_v28  ;;  %v2013_v46 = vld [vmem:[%s3019_s2 + $0x170] sm:$0xff]  ;;  %v2011_v52 = vld [vmem:[%s3019_s2 + $0x160] sm:$0xff]  ;;  %v2002_v53 = vld [vmem:[%s3019_s2 + $0x118] sm:$0xff] }
  0x1f   :  { %482 = vmatpush.bf16.msra.mxu1 %v1975_v29  ;;  %v2010_v54 = vld [vmem:[%s3019_s2 + $0x158] sm:$0xff]  ;;  %v46_v55 = vld [vmem:[%s3017_s0 + $0x30] sm:$0xff]  ;;  %v53_v56 = vld [vmem:[%s3017_s0 + $0x68] sm:$0xff] }
  0x20   :  { %496 = vmatpush.bf16.msra.mxu2 %v1983_v36  ;;  %v2001_v57 = vld [vmem:[%s3019_s2 + $0x110] sm:$0xff]  ;;  %v60_v59 = vpack.c.bf16 %v53_v56, %v46_v55  ;;  %v2000_v60 = vld [vmem:[%s3019_s2 + $0x108] sm:$0xff]  ;;  %v1999_v62 = vld [vmem:[%s3019_s2 + $0x100] sm:$0xff] }
  0x21   :  { %510 = vmatpush.bf16.msra.mxu3 %v1991_v37  ;;  %469 = vmatmul.bf16.vlgmr.msra.gmra.mxu0 %v54_v40  ;;  %v2009_v58 = vld [vmem:[%s3019_s2 + $0x150] sm:$0xff]  ;;  %v2008_v61 = vld [vmem:[%s3019_s2 + $0x148] sm:$0xff]  ;;  %v2007_v63 = vld [vmem:[%s3019_s2 + $0x140] sm:$0xff] }
  0x22   :  { %517 = vmatpush.bf16.msrb.mxu0 %v2006_v34  ;;  %483 = vmatmul.bf16.vlgmr.msra.gmra.mxu1 %v55_v43  ;;  %v44_v0 = vld [vmem:[%s3017_s0 + $0x20] sm:$0xff]  ;;  %v51_v1 = vld [vmem:[%s3017_s0 + $0x58] sm:$0xff]  ;;  %v45_v2 = vld [vmem:[%s3017_s0 + $0x28] sm:$0xff] }
  0x23   :  { %531 = vmatpush.bf16.msrb.mxu1 %v2014_v35  ;;  %497 = vmatmul.bf16.vlgmr.msra.gmra.mxu2 %v56_v47  ;;  %v52_v3 = vld [vmem:[%s3017_s0 + $0x60] sm:$0xff]  ;;  %v58_v4 = vpack.c.bf16 %v51_v1, %v44_v0  ;;  %v2023_v6 = vld [vmem:[%s3021_s4 + $0x38] sm:$0xff]  ;;  %v2022_v7 = vld [vmem:[%s3021_s4 + $0x30] sm:$0xff] }
  0x24   :  { %552 = vmatpush.bf16.msrb.mxu2 %v2015_v44  ;;  %511 = vmatmul.bf16.vlgmr.msra.gmra.mxu3 %v57_v48  ;;  %v59_v5 = vpack.c.bf16 %v52_v3, %v45_v2  ;;  %v2021_v8 = vld [vmem:[%s3021_s4 + $0x28] sm:$0xff]  ;;  %v2020_v9 = vld [vmem:[%s3021_s4 + $0x20] sm:$0xff]  ;;  %v2019_v10 = vld [vmem:[%s3021_s4 + $0x18] sm:$0xff] }
  0x25   :  { %630 = vmatpush.bf16.msrb.mxu3 %v2023_v6  ;;  %v2018_v11 = vld [vmem:[%s3021_s4 + $0x10] sm:$0xff]  ;;  %v2017_v12 = vld [vmem:[%s3021_s4 + $0x8] sm:$0xff]  ;;  %v2016_v16 = vld [vmem:[%s3021_s4] sm:$0xff] }
  0x26   :  { %518 = vmatpush.bf16.msrb.mxu0 %v2005_v45  ;;  %v2089_v17 = vld [vmem:[%s3020_s3] ss:$0 sm:$0xff]  ;;  %v1935_v0 = vld [vmem:[%s3025_s8 + $0x190] sm:$0xf]  ;;  %v2079_v1 = vld [vmem:[%s3025_s8 + $0x1a8] sm:$0xf0] }
  0x27   :  { %532 = vmatpush.bf16.msrb.mxu1 %v2013_v46  ;;  %v2025_v46 = vld [vmem:[%s3023_s6 + $0x8] sm:$0xff]  ;;  %v2090_v47 = vld [vmem:[%s3022_s5] ss:$0 sm:$0xff]  ;;  %s2204_s5 = smov 96   ;;  %v1936_v3 = vor.u32 %v2079_v1, %v1935_v0  ;;  %v2068_v6 = vld [vmem:[%s3025_s8 + $0x154] sm:$0xf] }
  0x28   :  { %695 = vmatpush.bf16.msra.mxu2 %v2025_v46  ;;  %v1787_v46 = vld [vmem:[%s3025_s8 + $0x70] sm:$0xf]  ;;  %v1759_v1 = vld [vmem:[%s3025_s8 + $0x38] sm:$0xf] }
  0x29   :  { %631 = vmatpush.bf16.msrb.mxu3 %v2022_v7 }
  0x2a   :  { %519 = vmatpush.bf16.msrb.mxu0 %v2004_v49 }
  0x2b   :  { %533 = vmatpush.bf16.msrb.mxu1 %v2012_v50 }
  0x2d   :  { %632 = vmatpush.bf16.msrb.mxu3 %v2021_v8  ;;  %v1901_v8 = vld [vmem:[%s3025_s8 + $0x16c] sm:$0xf0] }
  0x2e   :  { %520 = vmatpush.bf16.msrb.mxu0 %v2003_v51 }
  0x2f   :  { %534 = vmatpush.bf16.msrb.mxu1 %v2011_v52 }
  0x31   :  { %633 = vmatpush.bf16.msrb.mxu3 %v2020_v9  ;;  %v1907_v9 = vld [vmem:[%s3025_s8 + $0x158] sm:$0xf] }
  0x32   :  { %521 = vmatpush.bf16.msrb.mxu0 %v2002_v53 }
  0x33   :  { %535 = vmatpush.bf16.msrb.mxu1 %v2010_v54  ;;  %1687 = vmatmul.msk.bf16.vlgmr.msrb.gmra.mxu2 %vm457_vm0, %v60_v59  ;;  %v1927_v59 = vld [vmem:[%s3025_s8 + $0x188] sm:$0xf] }
  0x35   :  { %634 = vmatpush.bf16.msrb.mxu3 %v2019_v10  ;;  %v2072_v10 = vld [vmem:[%s3025_s8 + $0x170] sm:$0xf0] }
  0x36   :  { %522 = vmatpush.bf16.msrb.mxu0 %v2001_v57 }
  0x37   :  { %536 = vmatpush.bf16.msrb.mxu1 %v2009_v58  ;;  %v2024_v58 = vld [vmem:[%s3023_s6] sm:$0xff]  ;;  %s1461_s6 = sshll.u32 %s3027_s10, 4  ;;  %s1462_s6 = int_to_ptr.hbm [resolvable:$true] %s1461_s6 }
  0x38   :  { %696 = vmatpush.bf16.msra.mxu2 %v2024_v58  ;;  %v1795_v58 = vld [vmem:[%s3025_s8 + $0x78] sm:$0xf] }
  0x39   :  { %635 = vmatpush.bf16.msrb.mxu3 %v2018_v11  ;;  %v1904_v11 = vor.u32 %v2068_v6, %v1901_v8  ;;  %v2037_v6 = vld [vmem:[%s3025_s8 + $0x58] sm:$0xf0] }
  0x3a   :  { %523 = vmatpush.bf16.msrb.mxu0 %v2000_v60  ;;  %v2078_v60 = vld [vmem:[%s3025_s8 + $0x1a0] sm:$0xf0] }
  0x3b   :  { %537 = vmatpush.bf16.msrb.mxu1 %v2008_v61  ;;  %v2075_v61 = vld [vmem:[%s3025_s8 + $0x18c] sm:$0xf] }
  0x3c   :  { %1102 = vmatpush.bf16.msrb.mxu2 %v1936_v3  ;;  %v2033_v3 = vld [vmem:[%s3025_s8 + $0x3c] sm:$0xf] }
  0x3d   :  { %636 = vmatpush.bf16.msrb.mxu3 %v2017_v12  ;;  %v1908_v12 = vor.u32 %v2072_v10, %v1907_v9 }
  0x3e   :  { %524 = vmatpush.bf16.msrb.mxu0 %v1999_v62  ;;  %v1928_v62 = vor.u32 %v2078_v60, %v1927_v59  ;;  %v2044_v59 = vld [vmem:[%s3025_s8 + $0x90] sm:$0xf0]  ;;  %v650_v60 = vld [vmem:[%s3018_s1] sm:$0xff] }
  0x3f   :  { %538 = vmatpush.bf16.msrb.mxu1 %v2007_v63  ;;  %v1929_v63 = vld [vmem:[%s3025_s8 + $0x1a4] sm:$0xf0]  ;;  %v1796_v0 = vor.u32 %v2044_v59, %v1795_v58  ;;  %v1895_v59 = vld [vmem:[%s3025_s8 + $0x130] sm:$0xf] }
  0x40   :  { %v1932_v2 = vor.u32 %v2075_v61, %v1929_v63  ;;  %1103 = vmatpush.bf16.msrb.mxu2 %v1908_v12  ;;  %v1731_v12 = vld [vmem:[%s3025_s8] sm:$0xf] }
  0x41   :  { %525 = vmatmul.bf16.vlgmr.msrb.gmra.mxu0 %v58_v4  ;;  %637 = vmatpush.bf16.msrb.mxu3 %v2016_v16  ;;  %v1899_v4 = vld [vmem:[%s3025_s8 + $0x150] sm:$0xf]  ;;  %v1873_v16 = vld [vmem:[%s3025_s8 + $0x134] sm:$0xf0] }
  0x42   :  { %539 = vmatmul.bf16.vlgmr.msrb.gmra.mxu1 %v59_v5  ;;  %v2071_v5 = vld [vmem:[%s3025_s8 + $0x168] sm:$0xf0]  ;;  %1074 = vmatpush.bf16.msra.mxu0 %v1928_v62 }
  0x43   :  { %v1900_v7 = vor.u32 %v2071_v5, %v1899_v4  ;;  %1088 = vmatpush.bf16.msra.mxu1 %v1932_v2  ;;  %v2036_v2 = vld [vmem:[%s3025_s8 + $0x50] sm:$0xf0]  ;;  %v1761_v4 = vld [vmem:[%s3025_s8 + $0x54] sm:$0xf0]  ;;  %v1767_v5 = vld [vmem:[%s3025_s8 + $0x40] sm:$0xf] }
  0x44   :  { %v1760_v8 = vor.u32 %v2036_v2, %v1759_v1  ;;  %v1764_v10 = vor.u32 %v2033_v3, %v1761_v4  ;;  %v2059_v2 = vld [vmem:[%s3025_s8 + $0x108] sm:$0xf0]  ;;  %v2056_v3 = vld [vmem:[%s3025_s8 + $0xf4] sm:$0xf]  ;;  %v1861_v4 = vld [vmem:[%s3025_s8 + $0x10c] sm:$0xf0] }
  0x46   :  { %1075 = vmatpush.bf16.msra.mxu0 %v1900_v7  ;;  %v651_v7 = vld [vmem:[%s3018_s1 + $0x8] sm:$0xff]  ;;  %s2209_s1 = smov 896  }
  0x47   :  { %1089 = vmatpush.bf16.msra.mxu1 %v1904_v11  ;;  %v1768_v11 = vor.u32 %v2037_v6, %v1767_v5  ;;  %v1864_v6 = vor.u32 %v2056_v3, %v1861_v4 }
  0x9e   :  { %v470_v13 = vpop.f32.mrf.mxu0 }
  0x9f   :  { %v484_v14 = vpop.f32.mrf.mxu1  ;;  %v471_v18 = vadd.f32 %v2089_v17, %v470_v13  ;;  %v1871_v13 = vld [vmem:[%s3025_s8 + $0x118] sm:$0xf] }
  0xa1   :  { %v485_v22 = vadd.f32 %v484_v14, %v471_v18  ;;  %v2064_v14 = vld [vmem:[%s3025_s8 + $0x130] sm:$0xf0]  ;;  %v2065_v18 = vld [vmem:[%s3025_s8 + $0x138] sm:$0xf0] }
  0xa6   :  { %v498_v15 = vpop.f32.mrf.mxu2  ;;  %v472_v19 = vpop.f32.mrf.mxu0 }
  0xa7   :  { %v486_v20 = vpop.f32.mrf.mxu1  ;;  %v512_v23 = vpop.f32.mrf.mxu3  ;;  %v473_v24 = vadd.f32 %v2089_v17, %v472_v19  ;;  %v499_v25 = vadd.f32 %v498_v15, %v485_v22  ;;  %v2061_v15 = vld [vmem:[%s3025_s8 + $0x11c] sm:$0xf]  ;;  %v1879_v17 = vld [vmem:[%s3025_s8 + $0x120] sm:$0xf]  ;;  %v1872_v19 = vor.u32 %v2064_v14, %v1871_v13 }
  0xa8   :  { %v1876_v22 = vor.u32 %v2061_v15, %v1873_v16  ;;  %v2029_v13 = vld [vmem:[%s3025_s8 + $0x18] sm:$0xf0]  ;;  %v2026_v15 = vld [vmem:[%s3025_s8 + $0x4] sm:$0xf]  ;;  %v1733_v16 = vld [vmem:[%s3025_s8 + $0x1c] sm:$0xf0] }
  0xa9   :  { %v487_v26 = vadd.f32 %v486_v20, %v473_v24  ;;  %v513_v29 = vadd.f32 %v512_v23, %v499_v25  ;;  %v1843_v20 = vld [vmem:[%s3025_s8 + $0xe0] sm:$0xf]  ;;  %v1880_v23 = vor.u32 %v2065_v18, %v1879_v17  ;;  %v2054_v24 = vld [vmem:[%s3025_s8 + $0xe4] sm:$0xf]  ;;  %v2076_v25 = vld [vmem:[%s3025_s8 + $0x194] sm:$0xf]  ;;  %1076 = vmatpush.bf16.msra.mxu0 %v1872_v19 }
  0xaa   :  { %1090 = vmatpush.bf16.msra.mxu1 %v1876_v22  ;;  %v1739_v18 = vld [vmem:[%s3025_s8 + $0x8] sm:$0xf]  ;;  %v2030_v19 = vld [vmem:[%s3025_s8 + $0x20] sm:$0xf0] }
  0xab   :  { %1104 = vmatpush.bf16.msrb.mxu2 %v1880_v23  ;;  %v1736_v23 = vor.u32 %v2026_v15, %v1733_v16  ;;  %v1839_v15 = vld [vmem:[%s3025_s8 + $0xc0] sm:$0xf]  ;;  %v2053_v16 = vld [vmem:[%s3025_s8 + $0xd8] sm:$0xf0] }
  0xae   :  { %v500_v21 = vpop.f32.mrf.mxu2 }
  0xaf   :  { %v501_v31 = vadd.f32 %v500_v21, %v487_v26  ;;  %v514_v33 = vpop.f32.mrf.mxu3  ;;  %v2057_v21 = vld [vmem:[%s3025_s8 + $0xf8] sm:$0xf0]  ;;  %v1937_v26 = vld [vmem:[%s3025_s8 + $0x1ac] sm:$0xf0] }
  0xb1   :  { %v515_v34 = vadd.f32 %v514_v33, %v501_v31  ;;  %v2069_v31 = vld [vmem:[%s3025_s8 + $0x15c] sm:$0xf]  ;;  %v1815_v33 = vld [vmem:[%s3025_s8 + $0xa8] sm:$0xf] }
  0xb6   :  { %v554_v30 = vpop.f32.mrf.mxu2 }
  0xbe   :  { %v526_v27 = vpop.f32.mrf.mxu0  ;;  %v556_v41 = vpop.f32.mrf.mxu2 }
  0xbf   :  { %v540_v28 = vpop.f32.mrf.mxu1  ;;  %v527_v32 = vadd.f32 %v526_v27, %v513_v29  ;;  %v1845_v27 = vld [vmem:[%s3025_s8 + $0xfc] sm:$0xf0]  ;;  %v2058_v29 = vld [vmem:[%s3025_s8 + $0x100] sm:$0xf0] }
  0xc1   :  { %v541_v35 = vadd.f32 %v540_v28, %v527_v32  ;;  %v1851_v28 = vld [vmem:[%s3025_s8 + $0xe8] sm:$0xf]  ;;  %v1844_v32 = vor.u32 %v2057_v21, %v1843_v20  ;;  %v1732_v20 = vor.u32 %v2029_v13, %v1731_v12  ;;  %v2049_v12 = vld [vmem:[%s3025_s8 + $0xbc] sm:$0xf] }
  0xc3   :  { %v555_v39 = vadd.f32 %v554_v30, %v541_v35  ;;  %v1940_v30 = vor.u32 %v2076_v25, %v1937_v26  ;;  %v1909_v35 = vld [vmem:[%s3025_s8 + $0x174] sm:$0xf0]  ;;  %1077 = vmatpush.bf16.msra.mxu0 %v1844_v32  ;;  %v2048_v26 = vld [vmem:[%s3025_s8 + $0xb4] sm:$0xf] }
  0xc5   :  { %v559_v43 = vmax.f32 %v555_v39, 0.0  ;;  %1116 = vmatpush.bf16.msra.mxu3 %v1940_v30  ;;  %v1817_v39 = vld [vmem:[%s3025_s8 + $0xc4] sm:$0xf0]  ;;  %v1945_v30 = vld [vmem:[%s3025_s8 + $0x1b4] sm:$0xf0] }
  0xc6   :  { %v528_v36 = vpop.f32.mrf.mxu0 }
  0xc7   :  { %v529_v37 = vadd.f32 %v528_v36, %v515_v34  ;;  %v542_v38 = vpop.f32.mrf.mxu1  ;;  %v2050_v34 = vld [vmem:[%s3025_s8 + $0xc0] sm:$0xf0]  ;;  %v1848_v36 = vor.u32 %v2054_v24, %v1845_v27  ;;  %v1740_v24 = vor.u32 %v2030_v19, %v1739_v18  ;;  %v1840_v18 = vor.u32 %v2053_v16, %v1839_v15  ;;  %v1803_v19 = vld [vmem:[%s3025_s8 + $0x80] sm:$0xf] }
  0xc9   :  { %v543_v40 = vadd.f32 %v542_v38, %v529_v37  ;;  %v1852_v37 = vor.u32 %v2058_v29, %v1851_v28  ;;  %v2047_v38 = vld [vmem:[%s3025_s8 + $0xac] sm:$0xf]  ;;  %1091 = vmatpush.bf16.msra.mxu1 %v1848_v36  ;;  %v2080_v28 = vld [vmem:[%s3025_s8 + $0x1b0] sm:$0xf0]  ;;  %v2077_v29 = vld [vmem:[%s3025_s8 + $0x19c] sm:$0xf] }
  0xca   :  { %v1948_v32 = vor.u32 %v2077_v29, %v1945_v30  ;;  %v2041_v36 = vld [vmem:[%s3025_s8 + $0x7c] sm:$0xf]  ;;  %v1777_v29 = vld [vmem:[%s3025_s8 + $0x64] sm:$0xf0]  ;;  %v1783_v30 = vld [vmem:[%s3025_s8 + $0x50] sm:$0xf] }
  0xcb   :  { %v557_v42 = vadd.f32 %v556_v41, %v543_v40  ;;  %v1823_v40 = vld [vmem:[%s3025_s8 + $0xb0] sm:$0xf]  ;;  %v1912_v41 = vor.u32 %v2069_v31, %v1909_v35  ;;  %1105 = vmatpush.bf16.msrb.mxu2 %v1852_v37  ;;  %v1797_v37 = vld [vmem:[%s3025_s8 + $0x94] sm:$0xf0] }
  0xcd   :  { %v560_v44 = vmax.f32 %v557_v42, 0.0  ;;  %v2051_v42 = vld [vmem:[%s3025_s8 + $0xc8] sm:$0xf0]  ;;  %1117 = vmatpush.bf16.msra.mxu3 %v1912_v41  ;;  %v2070_v41 = vld [vmem:[%s3025_s8 + $0x164] sm:$0xf] }
  0xcf   :  { %v561_v45 = vpack.c.bf16 %v560_v44, %v559_v43  ;;  %v2062_v43 = vld [vmem:[%s3025_s8 + $0x124] sm:$0xf]  ;;  %v1881_v44 = vld [vmem:[%s3025_s8 + $0x13c] sm:$0xf0] }
  0xd1   :  { %638 = vmatmul.bf16.vlgmr.msrb.gmra.mxu3 %v561_v45  ;;  %v1816_v45 = vor.u32 %v2050_v34, %v1815_v33  ;;  %v1951_v33 = vld [vmem:[%s3025_s8 + $0x1a0] sm:$0xf]  ;;  %v2081_v34 = vld [vmem:[%s3025_s8 + $0x1b8] sm:$0xf0] }
  0xd2   :  { %v1952_v35 = vor.u32 %v2081_v34, %v1951_v33 }
  0xd3   :  { %1078 = vmatpush.bf16.msra.mxu0 %v1816_v45  ;;  %v1923_v45 = vld [vmem:[%s3025_s8 + $0x168] sm:$0xf] }
 0x154   :  { %v639_v48 = vpop.f32.mrf.mxu3 }
 0x155   :  { %v2494_v49 = vadd.f32 %v2090_v47, %v639_v48  ;;  %v1884_v48 = vor.u32 %v2062_v43, %v1881_v44 }
 0x157   :  { %v644_v50 = vmul.f32 0.5, %v2494_v49  ;;  %1453 = vst.msk [vmem:[#allocation4] sm:$0xff] %vm1452_vm1, %v2494_v49  ;;  %1118 = vmatpush.bf16.msra.mxu3 %v1884_v48  ;;  %v2034_v48 = vld [vmem:[%s3025_s8 + $0x44] sm:$0xf] }
 0x159   :  { %v646_v51 = vmul.f32 1.442695, %v644_v50  ;;  %v1820_v50 = vor.u32 %v2047_v38, %v1817_v39  ;;  %v1915_v38 = vld [vmem:[%s3025_s8 + $0x160] sm:$0xf]  ;;  %v1800_v39 = vor.u32 %v2041_v36, %v1797_v37  ;;  %v2031_v36 = vld [vmem:[%s3025_s8 + $0x28] sm:$0xf0] }
 0x15a   :  { %v2028_v37 = vld [vmem:[%s3025_s8 + $0x14] sm:$0xf] }
 0x15b   :  { %2092 = vpow2.f32 %v646_v51  ;;  %v1824_v51 = vor.u32 %v2051_v42, %v1823_v40  ;;  %1092 = vmatpush.bf16.msra.mxu1 %v1820_v50  ;;  %v2073_v40 = vld [vmem:[%s3025_s8 + $0x178] sm:$0xf0]  ;;  %v1917_v42 = vld [vmem:[%s3025_s8 + $0x17c] sm:$0xf0] }
 0x15c   :  { %v641_v52 = vpop.f32.mrf.mxu3  ;;  %v1916_v43 = vor.u32 %v2073_v40, %v1915_v38  ;;  %v1920_v44 = vor.u32 %v2070_v41, %v1917_v42  ;;  %v1769_v50 = vld [vmem:[%s3025_s8 + $0x5c] sm:$0xf0]  ;;  %v1749_v38 = vld [vmem:[%s3025_s8 + $0x2c] sm:$0xf0]  ;;  %v2032_v40 = vld [vmem:[%s3025_s8 + $0x30] sm:$0xf0] }
 0x15d   :  { %v2498_v53 = vadd.f32 %v2090_v47, %v641_v52  ;;  %v2043_v47 = vld [vmem:[%s3025_s8 + $0x88] sm:$0xf0]  ;;  %v2040_v52 = vld [vmem:[%s3025_s8 + $0x74] sm:$0xf]  ;;  %1106 = vmatpush.bf16.msrb.mxu2 %v1824_v51  ;;  %v1887_v51 = vld [vmem:[%s3025_s8 + $0x128] sm:$0xf]  ;;  %v1752_v42 = vor.u32 %v2028_v37, %v1749_v38 }
 0x15e   :  { %v1788_v61 = vor.u32 %v2043_v47, %v1787_v46  ;;  %v2074_v46 = vld [vmem:[%s3025_s8 + $0x180] sm:$0xf0] }
 0x15f   :  { %v645_v54 = vmul.f32 0.5, %v2498_v53  ;;  %1454 = vst.msk [vmem:[#allocation4 + $0x8] sm:$0xff] %vm1452_vm1, %v2498_v53  ;;  %v1924_v47 = vor.u32 %v2074_v46, %v1923_v45  ;;  %v2091_v45 = vld [vmem:[%s3024_s7] ss:$0 sm:$0xff]  ;;  %s2206_s7 = smov 128  }
 0x160   :  { %1079 = vmatpush.bf16.msra.mxu0 %v1788_v61 }
 0x161   :  { %v2093_v55 = vpop.eup %2092  ;;  %v648_v56 = vmul.f32 1.442695, %v645_v54  ;;  %v2055_v54 = vld [vmem:[%s3025_s8 + $0xec] sm:$0xf]  ;;  %1107 = vmatpush.bf16.msrb.mxu2 %v1796_v0  ;;  %v1859_v0 = vld [vmem:[%s3025_s8 + $0xf0] sm:$0xf] }
 0x162   :  { %654 = vrot.lane.b32.xlu0 %v2093_v55, %s2204_s5  ;;  %v1853_v55 = vld [vmem:[%s3025_s8 + $0x104] sm:$0xf0]  ;;  %v1860_v5 = vor.u32 %v2059_v2, %v1859_v0 }
 0x163   :  { %2094 = vpow2.f32 %v648_v56  ;;  %v1856_v62 = vor.u32 %v2055_v54, %v1853_v55  ;;  %v2066_v54 = vld [vmem:[%s3025_s8 + $0x140] sm:$0xf0]  ;;  %v2063_v55 = vld [vmem:[%s3025_s8 + $0x12c] sm:$0xf] }
 0x164   :  { %1080 = vmatpush.bf16.msra.mxu0 %v1760_v8  ;;  %v2060_v8 = vld [vmem:[%s3025_s8 + $0x110] sm:$0xf0] }
 0x165   :  { %1119 = vmatpush.bf16.msra.mxu3 %v1856_v62  ;;  %1108 = vmatpush.bf16.msrb.mxu2 %v1768_v11  ;;  %v2027_v62 = vld [vmem:[%s3025_s8 + $0xc] sm:$0xf]  ;;  %v2052_v11 = vld [vmem:[%s3025_s8 + $0xd0] sm:$0xf0] }
 0x168   :  { %1081 = vmatpush.bf16.msra.mxu0 %v1732_v20  ;;  %v2045_v20 = vld [vmem:[%s3025_s8 + $0x98] sm:$0xf0] }
 0x169   :  { %v2095_v57 = vpop.eup %2094  ;;  %1109 = vmatpush.bf16.msrb.mxu2 %v1740_v24  ;;  %v1811_v24 = vld [vmem:[%s3025_s8 + $0x88] sm:$0xf] }
 0x16a   :  { %656 = vrot.lane.b32.xlu0 %v2095_v57, %s2204_s5  ;;  %v1789_v57 = vld [vmem:[%s3025_s8 + $0x8c] sm:$0xf0] }
 0x16b   :  { %v1792_v63 = vor.u32 %v2040_v52, %v1789_v57  ;;  %v1772_v52 = vor.u32 %v2034_v48, %v1769_v50  ;;  %v1888_v57 = vor.u32 %v2066_v54, %v1887_v51  ;;  %v2858_v54 = vld [vmem:[%s3026_s9] sm:$0x7f]  ;;  %s2208_s9 = smov [#allocation2]  }
 0x16c   :  { %v775_v0 = vperm.slane %v2858_v54, 3  ;;  %s1459_s11 = sshll.u32 %s2208_s9, 4  ;;  %s1460_s11 = int_to_ptr.vmem [resolvable:$true] %s1459_s11 }
 0x16d   :  { %1093 = vmatpush.bf16.msra.mxu1 %v1792_v63  ;;  %v1741_v63 = vld [vmem:[%s3025_s8 + $0x24] sm:$0xf0] }
 0x16e   :  { %v1744_v1 = vor.u32 %v2027_v62, %v1741_v63  ;;  %v774_v63 = vperm.slane %v2858_v54, 2 }
 0x171   :  { %1094 = vmatpush.bf16.msra.mxu1 %v1764_v10  ;;  %v1831_v10 = vld [vmem:[%s3025_s8 + $0xb8] sm:$0xf] }
 0x172   :  { %v1832_v13 = vor.u32 %v2052_v11, %v1831_v10 }
 0x175   :  { %1095 = vmatpush.bf16.msra.mxu1 %v1736_v23  ;;  %v1805_v23 = vld [vmem:[%s3025_s8 + $0x9c] sm:$0xf0] }
 0x179   :  { %1144 = vmatpush.bf16.msrb.mxu1 %v1948_v32 }
 0x17d   :  { %1145 = vmatpush.bf16.msrb.mxu1 %v1920_v44 }
 0x1d4   :  { %v655_v56 = vpop.permute.xlu0 %654 }
 0x1d5   :  { %v660_v9 = vmul.f32 %v655_v56, %v650_v60  ;;  %v1889_v56 = vld [vmem:[%s3025_s8 + $0x144] sm:$0xf0]  ;;  %v2067_v60 = vld [vmem:[%s3025_s8 + $0x148] sm:$0xf0] }
 0x1d6   :  { %v1892_v58 = vor.u32 %v2063_v55, %v1889_v56  ;;  %v1896_v61 = vor.u32 %v2067_v60, %v1895_v59  ;;  %v772_v55 = vperm.slane %v2858_v54, 0  ;;  %v773_v56 = vperm.slane %v2858_v54, 1 }
 0x1d7   :  { %v662_v21 = vadd.f32 %v660_v9, %v2494_v49  ;;  %v1825_v49 = vld [vmem:[%s3025_s8 + $0xcc] sm:$0xf0] }
 0x1d8   :  { %v1828_v27 = vor.u32 %v2048_v26, %v1825_v49  ;;  %1146 = vmatpush.bf16.msrb.mxu1 %v1892_v58 }
 0x1da   :  { %1120 = vmatpush.bf16.msra.mxu3 %v1828_v27  ;;  %v2038_v27 = vld [vmem:[%s3025_s8 + $0x60] sm:$0xf0] }
 0x1dc   :  { %v657_v14 = vpop.permute.xlu0 %656  ;;  %1147 = vmatpush.bf16.msrb.mxu1 %v1864_v6 }
 0x1dd   :  { %v661_v17 = vmul.f32 %v657_v14, %v651_v7  ;;  %v1867_v7 = vld [vmem:[%s3025_s8 + $0xf8] sm:$0xf] }
 0x1de   :  { %1121 = vmatpush.bf16.msra.mxu3 %v1800_v39  ;;  %v1868_v9 = vor.u32 %v2060_v8, %v1867_v7  ;;  %v1833_v14 = vld [vmem:[%s3025_s8 + $0xd4] sm:$0xf0] }
 0x1df   :  { %v663_v22 = vadd.f32 %v661_v17, %v2498_v53  ;;  %v1943_v53 = vld [vmem:[%s3025_s8 + $0x198] sm:$0xf]  ;;  %v1836_v17 = vor.u32 %v2049_v12, %v1833_v14 }
 0x1e0   :  { %v1944_v31 = vor.u32 %v2080_v28, %v1943_v53  ;;  %v1775_v53 = vld [vmem:[%s3025_s8 + $0x48] sm:$0xf]  ;;  %v2035_v28 = vld [vmem:[%s3025_s8 + $0x4c] sm:$0xf]  ;;  %v1755_v39 = vld [vmem:[%s3025_s8 + $0x18] sm:$0xf] }
 0x1e1   :  { %v664_v25 = vpack.c.bf16 %v663_v22, %v662_v21  ;;  %v2042_v21 = vld [vmem:[%s3025_s8 + $0x84] sm:$0xf]  ;;  %v1804_v22 = vor.u32 %v2045_v20, %v1803_v19  ;;  %1148 = vmatpush.bf16.msrb.mxu1 %v1836_v17  ;;  %v1776_v32 = vor.u32 %v2038_v27, %v1775_v53  ;;  %v1780_v33 = vor.u32 %v2035_v28, %v1777_v29 }
 0x1e2   :  { %1130 = vmatpush.bf16.msrb.mxu0 %v1944_v31  ;;  %1122 = vmatpush.bf16.msra.mxu3 %v1772_v52  ;;  %v1808_v26 = vor.u32 %v2042_v21, %v1805_v23  ;;  %v2039_v31 = vld [vmem:[%s3025_s8 + $0x68] sm:$0xf0]  ;;  %v776_v23 = vperm.slane %v2858_v54, 4  ;;  %v777_v27 = vperm.slane %v2858_v54, 5 }
 0x1e3   :  { %1728 = vmatmul.msk.bf16.vlgmr.msra.gmra.mxu2 %vm685_vm2, %v664_v25  ;;  %v2046_v25 = vld [vmem:[%s3025_s8 + $0xa0] sm:$0xf0]  ;;  %v1784_v34 = vor.u32 %v2039_v31, %v1783_v30 }
 0x1e4   :  { %1158 = vmatpush.bf16.msra.mxu2 %v1952_v35  ;;  %v1812_v49 = vor.u32 %v2046_v25, %v1811_v24  ;;  %v1747_v35 = vld [vmem:[%s3025_s8 + $0x10] sm:$0xf]  ;;  %s2205_s8 = smov [#allocation4]  }
 0x1e5   :  { %1149 = vmatpush.bf16.msrb.mxu1 %v1808_v26  ;;  %v1748_v41 = vor.u32 %v2031_v36, %v1747_v35  ;;  %s1472_s29 = sshll.u32 %s2205_s8, 4  ;;  %s1473_s29 = int_to_ptr.vmem [resolvable:$true] %s1472_s29 }
 0x1e6   :  { %1131 = vmatpush.bf16.msrb.mxu0 %v1916_v43  ;;  %1123 = vmatpush.bf16.msra.mxu3 %v1744_v1  ;;  %v1756_v43 = vor.u32 %v2032_v40, %v1755_v39  ;;  %1480 = dma.vmem_to_hbm [thread:$0]  %s1473_s29, 256, %s1475_s13, [#allocation5], %s2206_s7, %s2206_s7, %s2207_s14  }
 0x1e8   :  { %1159 = vmatpush.bf16.msra.mxu2 %v1924_v47 }
 0x1e9   :  { %1150 = vmatpush.bf16.msrb.mxu1 %v1780_v33 }
 0x1ea   :  { %1132 = vmatpush.bf16.msrb.mxu0 %v1888_v57 }
 0x1ec   :  { %1160 = vmatpush.bf16.msra.mxu2 %v1896_v61 }
 0x1ed   :  { %1151 = vmatpush.bf16.msrb.mxu1 %v1752_v42 }
 0x1ee   :  { %1133 = vmatpush.bf16.msrb.mxu0 %v1860_v5 }
 0x1f0   :  { %1161 = vmatpush.bf16.msra.mxu2 %v1868_v9 }
 0x1f2   :  { %1134 = vmatpush.bf16.msrb.mxu0 %v1832_v13 }
 0x1f4   :  { %1162 = vmatpush.bf16.msra.mxu2 %v1840_v18 }
 0x1f6   :  { %1135 = vmatpush.bf16.msrb.mxu0 %v1804_v22 }
 0x1f8   :  { %1163 = vmatpush.bf16.msra.mxu2 %v1812_v49 }
 0x1fa   :  { %1136 = vmatpush.bf16.msrb.mxu0 %v1776_v32  ;;  %v778_v32 = vperm.slane %v2858_v54, 6 }
 0x1fc   :  { %1164 = vmatpush.bf16.msra.mxu2 %v1784_v34 }
 0x1fe   :  { %1137 = vmatpush.bf16.msrb.mxu0 %v1748_v41 }
 0x200   :  { %1165 = vmatpush.bf16.msra.mxu2 %v1756_v43 }
 0x266   :  { %v698_v44 = vpop.f32.mrf.mxu2 }
 0x267   :  { %v699_v46 = vadd.f32 %v2091_v45, %v698_v44 }
 0x269   :  { %v703_v50 = vmax.f32 %v699_v46, 0.0 }
 0x26e   :  { %v700_v47 = vpop.f32.mrf.mxu2 }
 0x26f   :  { %v701_v48 = vadd.f32 %v2091_v45, %v700_v47 }
 0x271   :  { %v704_v51 = vmax.f32 %v701_v48, 0.0 }
 0x273   :  { %v705_v52 = vpack.c.bf16 %v704_v51, %v703_v50 }
 0x275   :  { %1082 = vmatmul.bf16.vlgmr.msra.gmra.mxu0 %v705_v52  ;;  %1096 = vmatmul.bf16.vlgmr.msra.gmra.mxu1 %v705_v52 }
 0x276   :  { %1110 = vmatmul.bf16.vlgmr.msrb.gmra.mxu2 %v705_v52  ;;  %1124 = vmatmul.bf16.vlgmr.msra.gmra.mxu3 %v705_v52 }
 0x285   :  { %1138 = vmatmul.bf16.vlgmr.msrb.gmra.mxu0 %v705_v52  ;;  %1152 = vmatmul.bf16.vlgmr.msrb.gmra.mxu1 %v705_v52 }
 0x286   :  { %1166 = vmatmul.bf16.vlgmr.msra.gmra.mxu2 %v705_v52 }
 0x2f2   :  { %v1083_v57 = vpop.f32.mrf.mxu0  ;;  %v1097_v58 = vpop.f32.mrf.mxu1 }
 0x2f3   :  { %v1084_v59 = vadd.f32 %v1083_v57, %v772_v55  ;;  %v1098_v60 = vadd.f32 %v1097_v58, %v773_v56 }
 0x2f5   :  { %v1953_v61 = vmul.f32 -1.442695, %v1084_v59  ;;  %v1954_v62 = vmul.f32 -1.442695, %v1098_v60 }
 0x2f7   :  { %2096 = vpow2.f32 %v1953_v61 }
 0x2f8   :  { %2098 = vpow2.f32 %v1954_v62 }
 0x2f9   :  { %v1111_v1 = vpop.f32.mrf.mxu2  ;;  %v1125_v2 = vpop.f32.mrf.mxu3 }
 0x2fa   :  { %v1112_v3 = vadd.f32 %v1111_v1, %v774_v63  ;;  %v1126_v4 = vadd.f32 %v1125_v2, %v775_v0  ;;  %v1085_v5 = vpop.f32.mrf.mxu0  ;;  %v1099_v6 = vpop.f32.mrf.mxu1 }
 0x2fb   :  { %v1086_v7 = vadd.f32 %v1085_v5, %v772_v55  ;;  %v1100_v8 = vadd.f32 %v1099_v6, %v773_v56 }
 0x2fc   :  { %v1955_v9 = vmul.f32 -1.442695, %v1112_v3  ;;  %v1956_v10 = vmul.f32 -1.442695, %v1126_v4 }
 0x2fd   :  { %v2097_v11 = vpop.eup %2096  ;;  %v1960_v14 = vmul.f32 -1.442695, %v1086_v7  ;;  %v1961_v16 = vmul.f32 -1.442695, %v1100_v8 }
 0x2fe   :  { %v2099_v12 = vpop.eup %2098  ;;  %v1214_v13 = vadd.f32 1.0, %v2097_v11  ;;  %2100 = vpow2.f32 %v1955_v9 }
 0x2ff   :  { %v2864_v15 = vadd.f32 1.0, %v2099_v12  ;;  %2102 = vpow2.f32 %v1956_v10 }
 0x300   :  { %2104 = vrcp.f32 %v1214_v13  ;;  %v1237_v25 = vand.u32 2147483647, %v1214_v13  ;;  %v1239_v26 = vand.u32 2147483648, %v1214_v13  ;;  %vm1233_vm3 = vweird.f32 %v1214_v13 }
 0x301   :  { %2106 = vrcp.f32 %v2864_v15  ;;  %v1113_v17 = vpop.f32.mrf.mxu2  ;;  %v1127_v18 = vpop.f32.mrf.mxu3  ;;  %v1252_v29 = vand.u32 2147483647, %v2864_v15  ;;  %v1254_v30 = vand.u32 2147483648, %v2864_v15  ;;  %vm1248_vm4 = vweird.f32 %v2864_v15 }
 0x302   :  { %2108 = vpow2.f32 %v1960_v14  ;;  %v1114_v19 = vadd.f32 %v1113_v17, %v774_v63  ;;  %v1128_v22 = vadd.f32 %v1127_v18, %v775_v0  ;;  %v1139_v53 = vpop.f32.mrf.mxu0  ;;  %v1153_v35 = vpop.f32.mrf.mxu1  ;;  %vm2881_vm5 = vcmp.eq.f32.partialorder %v1237_v25, 8.507059e+37 }
 0x303   :  { %2110 = vpow2.f32 %v1961_v16  ;;  %v1140_v39 = vadd.f32 %v1139_v53, %v776_v23  ;;  %v1240_v43 = vor.u32 1.1754944e-38, %v1239_v26  ;;  %vm2886_vm6 = vcmp.eq.f32.partialorder %v1252_v29, 8.507059e+37 }
 0x304   :  { %v2101_v20 = vpop.eup %2100  ;;  %v1962_v21 = vmul.f32 -1.442695, %v1114_v19  ;;  %v1963_v38 = vmul.f32 -1.442695, %v1128_v22  ;;  %v1255_v46 = vor.u32 1.1754944e-38, %v1254_v30  ;;  %v1154_v47 = vadd.f32 %v1153_v35, %v777_v27 }
 0x305   :  { %v2103_v24 = vpop.eup %2102  ;;  %v2868_v49 = vadd.f32 1.0, %v2101_v20  ;;  %v1957_v55 = vmul.f32 -1.442695, %v1140_v39 }
 0x306   :  { %v2105_v28 = vpop.eup %2104  ;;  %v2873_v31 = vadd.f32 1.0, %v2103_v24  ;;  %v2902_v63 = vmul.f32 -1.442695, %v1154_v47 }
 0x307   :  { %v2107_v33 = vpop.eup %2106  ;;  %v1229_v34 = vmul.f32 %v2105_v28, %v1214_v13  ;;  %2112 = vrcp.f32 %v2868_v49  ;;  %vm1234_vm7 = vweird.f32 %v2105_v28  ;;  %v1267_v58 = vand.u32 2147483647, %v2868_v49 }
 0x308   :  { %v2109_v36 = vpop.eup %2108  ;;  %v1244_v37 = vmul.f32 %v2107_v33, %v2864_v15  ;;  %2114 = vpow2.f32 %v1962_v21  ;;  %vm1249_vm8 = vweird.f32 %v2107_v33  ;;  %v1269_v59 = vand.u32 2147483648, %v2868_v49  ;;  %vm1235_vm9 = vmor %vm1233_vm3, %vm1234_vm7 }
 0x309   :  { %v2111_v40 = vpop.eup %2110  ;;  %v1230_v41 = vsub.f32 1.0, %v1229_v34  ;;  %2116 = vrcp.f32 %v2873_v31  ;;  %v2892_v50 = vadd.f32 1.0, %v2109_v36  ;;  %vm1263_vm10 = vweird.f32 %v2868_v49  ;;  %vm1250_vm11 = vmor %vm1248_vm4, %vm1249_vm8  ;;  %v1167_v15 = vpop.f32.mrf.mxu2 }
 0x30a   :  { %v1245_v44 = vsub.f32 1.0, %v1244_v37  ;;  %v2894_v51 = vadd.f32 1.0, %v2111_v40  ;;  %2118 = vpow2.f32 %v1963_v38  ;;  %vm1278_vm12 = vweird.f32 %v2873_v31  ;;  %v1155_v45 = vpop.f32.mrf.mxu1 }
 0x30b   :  { %v1231_v48 = vmul.f32 %v2105_v28, %v1230_v41  ;;  %2120 = vrcp.f32 %v2892_v50  ;;  %v1282_v2 = vand.u32 2147483647, %v2873_v31  ;;  %vm2915_vm13 = vcmp.eq.f32.partialorder %v1267_v58, 8.507059e+37  ;;  %v1141_v41 = vpop.f32.mrf.mxu0 }
 0x30c   :  { %v1246_v52 = vmul.f32 %v2107_v33, %v1245_v44  ;;  %2122 = vrcp.f32 %v2894_v51  ;;  %v1270_v9 = vor.u32 1.1754944e-38, %v1269_v59  ;;  %v1284_v10 = vand.u32 2147483648, %v2873_v31 }
 0x30d   :  { %v2113_v56 = vpop.eup %2112  ;;  %v1232_v57 = vadd.f32 %v2105_v28, %v1231_v48  ;;  %vm2922_vm1 = vcmp.eq.f32.partialorder %v1282_v2, 8.507059e+37  ;;  %v1342_v18 = vand.u32 2147483647, %v2892_v50  ;;  %2124 = vpow2.f32 %v1957_v55 }
 0x30e   :  { %v2115_v60 = vpop.eup %2114  ;;  %v1247_v61 = vadd.f32 %v2107_v33, %v1246_v52  ;;  %v1259_v62 = vmul.f32 %v2113_v56, %v2868_v49  ;;  %vm1264_vm14 = vweird.f32 %v2113_v56  ;;  %v1285_v25 = vor.u32 1.1754944e-38, %v1284_v10 }
 0x30f   :  { %v2117_v0 = vpop.eup %2116  ;;  %v1236_v1 = vsel %vm1235_vm9, %v2105_v28, %v1232_v57  ;;  %v2920_v14 = vadd.f32 1.0, %v2115_v60  ;;  %vm1265_vm2 = vmor %vm1263_vm10, %vm1264_vm14  ;;  %vm1338_vm3 = vweird.f32 %v2892_v50  ;;  %v1168_v26 = vadd.f32 %v1167_v15, %v778_v32 }
 0x310   :  { %v1241_v3 = vsel %vm2881_vm5, %v1240_v43, %v1236_v1  ;;  %v1251_v4 = vsel %vm1250_vm11, %v2107_v33, %v1247_v61  ;;  %v1260_v5 = vsub.f32 1.0, %v1259_v62  ;;  %v1274_v6 = vmul.f32 %v2117_v0, %v2873_v31  ;;  %v2119_v11 = vpop.eup %2118 }
 0x311   :  { %1438 = vst [vmem:[#allocation2] sm:$0xff] %v1241_v3  ;;  %v1256_v7 = vsel %vm2886_vm6, %v1255_v46, %v1251_v4  ;;  %v2121_v16 = vpop.eup %2120  ;;  %vm1279_vm15 = vweird.f32 %v2117_v0  ;;  %v2928_v22 = vadd.f32 1.0, %v2119_v11  ;;  %2126 = vrcp.f32 %v2920_v14 }
 0x312   :  { %1439 = vst [vmem:[#allocation2 + $0x8] sm:$0xff] %v1256_v7  ;;  %v1261_v12 = vmul.f32 %v2113_v56, %v1260_v5  ;;  %v1275_v13 = vsub.f32 1.0, %v1274_v6  ;;  %v1334_v21 = vmul.f32 %v2121_v16, %v2892_v50  ;;  %v2123_v24 = vpop.eup %2122  ;;  %vm1280_vm4 = vmor %vm1278_vm12, %vm1279_vm15  ;;  %vm1339_vm5 = vweird.f32 %v2121_v16 }
 0x313   :  { %v1349_v30 = vmul.f32 %v2123_v24, %v2894_v51  ;;  %vm2942_vm6 = vcmp.eq.f32.partialorder %v1342_v18, 8.507059e+37  ;;  %v1344_v34 = vand.u32 2147483648, %v2892_v50  ;;  %2128 = vrcp.f32 %v2928_v22  ;;  %v2125_v38 = vpop.eup %2124  ;;  %vm1340_vm9 = vmor %vm1338_vm3, %vm1339_vm5 }
 0x314   :  { %v1262_v19 = vadd.f32 %v2113_v56, %v1261_v12  ;;  %v1276_v20 = vmul.f32 %v2117_v0, %v1275_v13  ;;  %v1335_v29 = vsub.f32 1.0, %v1334_v21  ;;  %vm1353_vm7 = vweird.f32 %v2894_v51 }
 0x315   :  { %v1350_v37 = vsub.f32 1.0, %v1349_v30  ;;  %v1357_v31 = vand.u32 2147483647, %v2894_v51  ;;  %v1359_v40 = vand.u32 2147483648, %v2894_v51  ;;  %vm1354_vm8 = vweird.f32 %v2123_v24 }
 0x316   :  { %v1266_v53 = vsel %vm1265_vm2, %v2113_v56, %v1262_v19  ;;  %v1277_v28 = vadd.f32 %v2117_v0, %v1276_v20  ;;  %v1336_v36 = vmul.f32 %v2121_v16, %v1335_v29  ;;  %v2953_v44 = vadd.f32 1.0, %v2125_v38  ;;  %vm1355_vm10 = vmor %vm1353_vm7, %vm1354_vm8 }
 0x317   :  { %v1271_v33 = vsel %vm2915_vm13, %v1270_v9, %v1266_v53  ;;  %v1351_v43 = vmul.f32 %v2123_v24, %v1350_v37  ;;  %v2127_v46 = vpop.eup %2126  ;;  %v1345_v47 = vor.u32 1.1754944e-38, %v1344_v34  ;;  %v1374_v48 = vand.u32 2147483648, %v2920_v14 }
 0x318   :  { %1440 = vst [vmem:[#allocation2 + $0x10] sm:$0xff] %v1271_v33  ;;  %v1281_v35 = vsel %vm1280_vm4, %v2117_v0, %v1277_v28  ;;  %v1337_v42 = vadd.f32 %v2121_v16, %v1336_v36  ;;  %2130 = vpow2.f32 %v2902_v63  ;;  %v1959_v52 = vmul.f32 -1.442695, %v1168_v26 }
 0x319   :  { %v1286_v39 = vsel %vm2922_vm1, %v1285_v25, %v1281_v35  ;;  %v1352_v56 = vadd.f32 %v2123_v24, %v1351_v43  ;;  %v1364_v57 = vmul.f32 %v2127_v46, %v2920_v14  ;;  %v1142_v58 = vadd.f32 %v1141_v41, %v776_v23  ;;  %v2129_v61 = vpop.eup %2128  ;;  %v1169_v23 = vpop.f32.mrf.mxu2 }
 0x31a   :  { %1441 = vst [vmem:[#allocation2 + $0x18] sm:$0xff] %v1286_v39  ;;  %v1341_v55 = vsel %vm1340_vm9, %v2121_v16, %v1337_v42  ;;  %v1360_v50 = vor.u32 1.1754944e-38, %v1359_v40  ;;  %2132 = vrcp.f32 %v2953_v44  ;;  %v1156_v60 = vadd.f32 %v1155_v45, %v777_v27 }
 0x31b   :  { %v1346_v59 = vsel %vm2942_vm6, %v1345_v47, %v1341_v55  ;;  %v1356_v62 = vsel %vm1355_vm10, %v2123_v24, %v1352_v56  ;;  %vm1358_vm11 = vcmp.eq.f32.partialorder %v1357_v31, 8.507059e+37  ;;  %v1365_v63 = vsub.f32 1.0, %v1364_v57 }
 0x31c   :  { %1445 = vst [vmem:[#allocation2 + $0x38] sm:$0xff] %v1346_v59  ;;  %vm1368_vm12 = vweird.f32 %v2920_v14  ;;  %v1361_v0 = vsel %vm1358_vm11, %v1360_v50, %v1356_v62  ;;  %v1372_v1 = vand.u32 2147483647, %v2920_v14  ;;  %v1379_v51 = vmul.f32 %v2129_v61, %v2928_v22 }
 0x31d   :  { %2134 = vpow2.f32 %v1959_v52  ;;  %1446 = vst [vmem:[#allocation2 + $0x40] sm:$0xff] %v1361_v0  ;;  %v1366_v2 = vmul.f32 %v2127_v46, %v1365_v63  ;;  %vm1369_vm13 = vweird.f32 %v2127_v46  ;;  %v1375_v3 = vor.u32 1.1754944e-38, %v1374_v48 }
 0x31e   :  { %v1964_v4 = vmul.f32 -1.442695, %v1142_v58  ;;  %v2131_v27 = vpop.eup %2130  ;;  %v1380_v5 = vsub.f32 1.0, %v1379_v51  ;;  %v1387_v6 = vand.u32 2147483647, %v2928_v22  ;;  %v1170_v8 = vadd.f32 %v1169_v23, %v778_v32  ;;  %vm1370_vm14 = vmor %vm1368_vm12, %vm1369_vm13 }
 0x31f   :  { %v1965_v7 = vmul.f32 -1.442695, %v1156_v60  ;;  %v1367_v9 = vadd.f32 %v2127_v46, %v1366_v2  ;;  %v1389_v10 = vand.u32 2147483648, %v2928_v22  ;;  %v2977_v11 = vadd.f32 1.0, %v2131_v27 }
 0x320   :  { %2136 = vpow2.f32 %v1964_v4  ;;  %v2133_v12 = vpop.eup %2132  ;;  %v1381_v13 = vmul.f32 %v2129_v61, %v1380_v5  ;;  %vm1384_vm15 = vweird.f32 %v2129_v61  ;;  %v1966_v15 = vmul.f32 -1.442695, %v1170_v8 }
 0x321   :  { %2138 = vpow2.f32 %v1965_v7  ;;  %v1371_v16 = vsel %vm1370_vm14, %v2127_v46, %v1367_v9  ;;  %vm1373_vm1 = vcmp.eq.f32.partialorder %v1372_v1, 8.507059e+37  ;;  %v1289_v17 = vmul.f32 %v2133_v12, %v2953_v44 }
 0x322   :  { %2140 = vrcp.f32 %v2977_v11  ;;  %v1376_v32 = vsel %vm1373_vm1, %v1375_v3, %v1371_v16  ;;  %v1382_v18 = vadd.f32 %v2129_v61, %v1381_v13  ;;  %vm1383_vm2 = vweird.f32 %v2928_v22 }
 0x323   :  { %v2135_v54 = vpop.eup %2134  ;;  %1447 = vst [vmem:[#allocation2 + $0x48] sm:$0xff] %v1376_v32  ;;  %vm1385_vm3 = vmor %vm1383_vm2, %vm1384_vm15  ;;  %vm1388_vm4 = vcmp.eq.f32.partialorder %v1387_v6, 8.507059e+37  ;;  %v1390_v14 = vor.u32 1.1754944e-38, %v1389_v10  ;;  %v1290_v19 = vsub.f32 1.0, %v1289_v17  ;;  %v1297_v24 = vand.u32 2147483647, %v2953_v44 }
 0x324   :  { %v1220_v20 = vadd.f32 1.0, %v2135_v54  ;;  %v1386_v21 = vsel %vm1385_vm3, %v2129_v61, %v1382_v18  ;;  %v1299_v25 = vand.u32 2147483648, %v2953_v44  ;;  %2142 = vpow2.f32 %v1966_v15 }
 0x325   :  { %v1391_v53 = vsel %vm1388_vm4, %v1390_v14, %v1386_v21  ;;  %v1291_v28 = vmul.f32 %v2133_v12, %v1290_v19  ;;  %vm1294_vm5 = vweird.f32 %v2133_v12  ;;  %vm1293_vm6 = vweird.f32 %v2953_v44 }
 0x326   :  { %v2137_v26 = vpop.eup %2136  ;;  %2144 = vrcp.f32 %v1220_v20  ;;  %1448 = vst [vmem:[#allocation2 + $0x50] sm:$0xff] %v1391_v53  ;;  %vm1295_vm7 = vmor %vm1293_vm6, %vm1294_vm5  ;;  %v1300_v34 = vor.u32 1.1754944e-38, %v1299_v25  ;;  %vm1298_vm8 = vcmp.eq.f32.partialorder %v1297_v24, 8.507059e+37  ;;  %v1312_v40 = vand.u32 2147483647, %v2977_v11 }
 0x327   :  { %v2139_v29 = vpop.eup %2138  ;;  %v2986_v22 = vadd.f32 1.0, %v2137_v26  ;;  %v1292_v33 = vadd.f32 %v2133_v12, %v1291_v28  ;;  %v1314_v41 = vand.u32 2147483648, %v2977_v11  ;;  %vm1308_vm10 = vweird.f32 %v2977_v11 }
 0x328   :  { %v2141_v30 = vpop.eup %2140  ;;  %v2989_v49 = vadd.f32 1.0, %v2139_v29  ;;  %v1327_v47 = vand.u32 2147483647, %v1220_v20  ;;  %vm1313_vm12 = vcmp.eq.f32.partialorder %v1312_v40, 8.507059e+37  ;;  %v1329_v55 = vand.u32 2147483648, %v1220_v20 }
 0x329   :  { %v1304_v35 = vmul.f32 %v2141_v30, %v2977_v11  ;;  %v1296_v36 = vsel %vm1295_vm7, %v2133_v12, %v1292_v33  ;;  %2146 = vrcp.f32 %v2986_v22  ;;  %vm1309_vm9 = vweird.f32 %v2141_v30 }
 0x32a   :  { %v2143_v37 = vpop.eup %2142  ;;  %v1301_v38 = vsel %vm1298_vm8, %v1300_v34, %v1296_v36  ;;  %2148 = vrcp.f32 %v2989_v49  ;;  %vm1310_vm11 = vmor %vm1308_vm10, %vm1309_vm9  ;;  %v1315_v52 = vor.u32 1.1754944e-38, %v1314_v41  ;;  %vm1323_vm14 = vweird.f32 %v1220_v20 }
 0x32b   :  { %v1305_v39 = vsub.f32 1.0, %v1304_v35  ;;  %1442 = vst [vmem:[#allocation2 + $0x20] sm:$0xff] %v1301_v38  ;;  %v2996_v44 = vadd.f32 1.0, %v2143_v37  ;;  %vm1328_vm15 = vcmp.eq.f32.partialorder %v1327_v47, 8.507059e+37  ;;  %v1330_v63 = vor.u32 1.1754944e-38, %v1329_v55 }
 0x32c   :  { %v2145_v31 = vpop.eup %2144  ;;  %v1402_v23 = vand.u32 2147483647, %v2986_v22  ;;  %v1404_v0 = vand.u32 2147483648, %v2986_v22  ;;  %v1419_v3 = vand.u32 2147483648, %v2989_v49  ;;  %v1417_v6 = vand.u32 2147483647, %v2989_v49 }
 0x32d   :  { %v1306_v42 = vmul.f32 %v2141_v30, %v1305_v39  ;;  %v1319_v43 = vmul.f32 %v2145_v31, %v1220_v20  ;;  %2150 = vrcp.f32 %v2996_v44  ;;  %vm1324_vm13 = vweird.f32 %v2145_v31 }
 0x32e   :  { %vm1325_vm1 = vmor %vm1323_vm14, %vm1324_vm13  ;;  %vm1398_vm4 = vweird.f32 %v2986_v22  ;;  %v1405_v9 = vor.u32 1.1754944e-38, %v1404_v0  ;;  %vm1413_vm6 = vweird.f32 %v2989_v49  ;;  %vm1403_vm7 = vcmp.eq.f32.partialorder %v1402_v23, 8.507059e+37 }
 0x32f   :  { %v1307_v45 = vadd.f32 %v2141_v30, %v1306_v42  ;;  %v1320_v46 = vsub.f32 1.0, %v1319_v43  ;;  %v2147_v48 = vpop.eup %2146  ;;  %v1420_v12 = vor.u32 1.1754944e-38, %v1419_v3  ;;  %vm1418_vm9 = vcmp.eq.f32.partialorder %v1417_v6, 8.507059e+37 }
 0x330   :  { %v2149_v56 = vpop.eup %2148  ;;  %v1394_v59 = vmul.f32 %v2147_v48, %v2986_v22  ;;  %vm1399_vm2 = vweird.f32 %v2147_v48  ;;  %v1434_v17 = vand.u32 2147483648, %v2996_v44  ;;  %v1432_v18 = vand.u32 2147483647, %v2996_v44 }
 0x331   :  { %v1311_v57 = vsel %vm1310_vm11, %v2141_v30, %v1307_v45  ;;  %v1321_v58 = vmul.f32 %v2145_v31, %v1320_v46  ;;  %v1409_v60 = vmul.f32 %v2149_v56, %v2989_v49  ;;  %vm1414_vm3 = vweird.f32 %v2149_v56  ;;  %vm1400_vm5 = vmor %vm1398_vm4, %vm1399_vm2 }
 0x332   :  { %v1316_v50 = vsel %vm1313_vm12, %v1315_v52, %v1311_v57  ;;  %v1395_v62 = vsub.f32 1.0, %v1394_v59  ;;  %vm1415_vm8 = vmor %vm1413_vm6, %vm1414_vm3  ;;  %vm1428_vm11 = vweird.f32 %v2996_v44  ;;  %v1435_v19 = vor.u32 1.1754944e-38, %v1434_v17 }
 0x333   :  { %1443 = vst [vmem:[#allocation2 + $0x28] sm:$0xff] %v1316_v50  ;;  %v1322_v61 = vadd.f32 %v2145_v31, %v1321_v58  ;;  %v1410_v1 = vsub.f32 1.0, %v1409_v60  ;;  %v2151_v4 = vpop.eup %2150  ;;  %vm1433_vm13 = vcmp.eq.f32.partialorder %v1432_v18, 8.507059e+37 }
 0x334   :  { %v1396_v2 = vmul.f32 %v2147_v48, %v1395_v62  ;;  %v1424_v8 = vmul.f32 %v2151_v4, %v2996_v44  ;;  %vm1429_vm10 = vweird.f32 %v2151_v4 }
 0x335   :  { %v1326_v51 = vsel %vm1325_vm1, %v2145_v31, %v1322_v61  ;;  %v1411_v5 = vmul.f32 %v2149_v56, %v1410_v1  ;;  %vm1430_vm12 = vmor %vm1428_vm11, %vm1429_vm10 }
 0x336   :  { %v1331_v27 = vsel %vm1328_vm15, %v1330_v63, %v1326_v51  ;;  %v1397_v7 = vadd.f32 %v2147_v48, %v1396_v2  ;;  %v1425_v13 = vsub.f32 1.0, %v1424_v8 }
 0x337   :  { %1444 = vst.msk [vmem:[#allocation2 + $0x30] sm:$0xff] %vm457_vm0, %v1331_v27  ;;  %v1412_v10 = vadd.f32 %v2149_v56, %v1411_v5 }
 0x338   :  { %v1401_v11 = vsel %vm1400_vm5, %v2147_v48, %v1397_v7  ;;  %v1426_v32 = vmul.f32 %v2151_v4, %v1425_v13 }
 0x339   :  { %v1406_v15 = vsel %vm1403_vm7, %v1405_v9, %v1401_v11  ;;  %v1416_v16 = vsel %vm1415_vm8, %v2149_v56, %v1412_v10 }
 0x33a   :  { %1449 = vst [vmem:[#allocation2 + $0x58] sm:$0xff] %v1406_v15  ;;  %v1421_v54 = vsel %vm1418_vm9, %v1420_v12, %v1416_v16  ;;  %v1427_v14 = vadd.f32 %v2151_v4, %v1426_v32 }
 0x33b   :  { %1450 = vst [vmem:[#allocation2 + $0x60] sm:$0xff] %v1421_v54 }
 0x33c   :  { %v1431_v20 = vsel %vm1430_vm12, %v2151_v4, %v1427_v14 }
 0x33d   :  { %v1436_v21 = vsel %vm1433_vm13, %v1435_v19, %v1431_v20 }
 0x33e   :  { %1451 = vst.msk [vmem:[#allocation2 + $0x68] sm:$0xff] %vm457_vm0, %v1436_v21 }
 0x33f   :  { %1467 = dma.vmem_to_hbm [thread:$0]  %s1460_s11, 1792, %s1462_s6, [#allocation3], %s2209_s1, %s2209_s1, %s2210_s18  }
 0x340   :  { %2200 = dma.done.wait [#allocation3], 1792  }
 0x341   :  { %2201 = vsyncadd [#allocation3], 4294965504 }
 0x342   :  { %2202 = dma.done.wait [#allocation5], 256  }
 0x343   :  { %2203 = vsyncadd [#allocation5], 4294967040 }
 0x344   :  { %1489 = vsyncpa [#allocation3], 1 }
 0x345   :  { %1490 = vsyncpa [#allocation5], 1 }

</bundles_post_ra>
